<compile_context>
chip_gen: v6e
topology: v6e:2x2x1
jax: 0.10.0
libtpu: 0.0.40
codegen_flags: <defaults>
</compile_context>

<pallas_src>
import functools

import jax
import jax.numpy as jnp
from jax import lax
from jax.experimental import pallas as pl
from jax.experimental.pallas import tpu as pltpu

_SUPPORTED_ACTS = ("relu", "sigmoid", "tanh", "softmax")


def _apply_act_f32(y, act, valid_cols):
    """Activation on the f32 accumulator (fast path on v5e/v6e/v7x)."""
    if act is None:
        return y
    if act == "relu":
        return jnp.maximum(y, 0.0)
    if act == "sigmoid":
        return jax.nn.sigmoid(y)
    if act == "tanh":
        return jnp.tanh(y)
    if act == "softmax":
        # If the lane dim was padded, mask padded columns to -inf so they do
        # not contribute to the normalization (correctness concern from review).
        if valid_cols != y.shape[-1]:
            col = lax.broadcasted_iota(jnp.int32, y.shape, 1)
            y = jnp.where(col < valid_cols, y, -jnp.inf)
        return jax.nn.softmax(y, axis=-1)
    raise ValueError(f"unsupported activation: {act}")


def _linear_act_kernel(x_ref, w_ref, o_ref, *, act, valid_cols):
    """One M-tile: (TM, K) @ (N_pad, K)^T on the MXU, fused optional activation.

    x_ref: (TM, K)       activation tile (pipelined over M)
    w_ref: (N_pad, K)    weight in native PyTorch (out, in) layout, VMEM-resident
    o_ref: (TM, N_pad)   lane-dense output tile
    """
    y = lax.dot_general(
        x_ref[...],
        w_ref[...],
        dimension_numbers=(((1,), (1,)), ((), ())),  # contract K with K
        preferred_element_type=jnp.float32,
    )
    y = _apply_act_f32(y, act, valid_cols)
    o_ref[...] = y.astype(o_ref.dtype)


def outputer_forward(
    x,
    weight,
    out_act_type=None,
    *,
    bias=None,
    binary=False,
    batch_norm=False,
    block_m=512,
    vmem_budget_bytes=8 * 1024 * 1024,
    use_pallas=None,
):
    """Pallas implementation of Outputer.forward.

    x:      (T, N, in_size) or (B, in_size)
    weight: (out_size, in_size)  -- PyTorch nn.Linear weight layout
    """
    if binary or batch_norm or bias is not None:
        # TODO(synk): BinaryLinear (sign(W)) mode, BatchNorm1d and bias are not
        # part of the default Outputer config and are not implemented here.
        raise NotImplementedError(
            "outputer_forward only implements the default Outputer config "
            "(binary=False, batch_norm=False, bias=False)."
        )
    if out_act_type is not None:
        out_act_type = out_act_type.lower()
        assert out_act_type in _SUPPORTED_ACTS, (
            "act_type should be either relu, sigmoid, softmax or tanh"
        )

    orig_shape = x.shape
    x2d = x.reshape(-1, orig_shape[-1]) if x.ndim > 2 else x

    M, K = x2d.shape
    out_size, in_size = weight.shape
    assert in_size == K

    # Tiny problems: a standalone Pallas call is pure launch overhead; let XLA
    # fuse the matmul instead.  Callers can force the Pallas path.
    if use_pallas is None:
        use_pallas = (2 * M * K * out_size) >= 1_000_000
    if not use_pallas:
        y2d = _apply_act_f32(
            jnp.dot(x2d, weight.T, preferred_element_type=jnp.float32),
            out_act_type,
            out_size,
        ).astype(x2d.dtype)
        if x.ndim > 2:
            return y2d.reshape(orig_shape[0], orig_shape[1], out_size)
        return y2d

    itemsize = jnp.dtype(x2d.dtype).itemsize

    # Lane-dense output: pad out_size up to a multiple of 128 so stores are
    # unmasked; padded weight rows are zero and sliced off afterwards.
    n_pad = pl.cdiv(out_size, 128) * 128
    w_p = weight if n_pad == out_size else jnp.pad(
        weight, ((0, n_pad - out_size), (0, 0))
    )

    # Pick the M tile: as large as possible (better pipelining) while keeping
    # double-buffered x/out tiles + the resident weight within a conservative
    # VMEM budget (safe on v7x's 32 MiB default scoped VMEM).
    if M <= block_m:
        tm = M  # full dim -> always layout-legal, even if not a multiple of 8
    else:
        tm = block_m  # multiple of 8
        while tm > 8 and (2 * tm * (K + n_pad) + 2 * n_pad * K) * itemsize > vmem_budget_bytes:
            tm //= 2

    grid_m = pl.cdiv(M, tm)

    kernel = functools.partial(
        _linear_act_kernel, act=out_act_type, valid_cols=out_size
    )

    transcendentals = (
        M * out_size if out_act_type in ("sigmoid", "tanh", "softmax") else 0
    )
    cost = pl.CostEstimate(
        flops=2 * M * K * out_size,
        transcendentals=transcendentals,
        bytes_accessed=(M * K + out_size * K + M * out_size) * itemsize,
    )

    y_padded = pl.pallas_call(
        kernel,
        out_shape=jax.ShapeDtypeStruct((M, n_pad), x2d.dtype),
        grid_spec=pltpu.PrefetchScalarGridSpec(
            num_scalar_prefetch=0,
            grid=(grid_m,),
            in_specs=[
                # x tile pipelined over M.
                pl.BlockSpec((tm, K), lambda i: (i, 0)),
                # Weight (native (out, in) layout) stays resident across the grid.
                pl.BlockSpec((n_pad, K), lambda i: (0, 0)),
            ],
            out_specs=pl.BlockSpec((tm, n_pad), lambda i: (i, 0)),
        ),
        compiler_params=pltpu.CompilerParams(
            # M tiles are independent -> let v7x shard them across both TCs.
            dimension_semantics=("parallel",),
        ),
        cost_estimate=cost,
    )(x2d, w_p)

    y2d = y_padded[:, :out_size] if n_pad != out_size else y_padded

    if x.ndim > 2:
        return y2d.reshape(orig_shape[0], orig_shape[1], out_size)
    return y2d


if __name__ == "__main__":
    # Small shapes consistent with the module: x is (T, N, in_size).
    T, N, IN_SIZE, OUT_SIZE = 2, 8, 32, 64

    key = jax.random.PRNGKey(0)
    kx, kw = jax.random.split(key)

    x = jax.random.normal(kx, (T, N, IN_SIZE), dtype=jnp.float32)
    # Deterministic init mimicking nn.Linear's uniform(-1/sqrt(in), 1/sqrt(in)).
    bound = 1.0 / (IN_SIZE ** 0.5)
    weight = jax.random.uniform(
        kw, (OUT_SIZE, IN_SIZE), dtype=jnp.float32, minval=-bound, maxval=bound
    )

    # Default Outputer config (no activation); force the Pallas path so the
    # kernel itself is exercised even at this tiny size.
    y = outputer_forward(x, weight, out_act_type=None, use_pallas=True)
    y = jax.block_until_ready(y)

    y_ref = (x.reshape(-1, IN_SIZE) @ weight.T).reshape(T, N, OUT_SIZE)
    assert y.shape == (T, N, OUT_SIZE)
    assert jnp.allclose(y, y_ref, atol=1e-5, rtol=1e-5)

    # Also exercise the softmax branch to verify the padded-lane masking
    # (out_size=64 is padded to 128 lanes inside the kernel).
    y_sm = outputer_forward(x, weight, out_act_type="softmax", use_pallas=True)
    y_sm = jax.block_until_ready(y_sm)
    y_sm_ref = jax.nn.softmax(
        (x.reshape(-1, IN_SIZE) @ weight.T), axis=-1
    ).reshape(T, N, OUT_SIZE)
    assert jnp.allclose(y_sm, y_sm_ref, atol=1e-5, rtol=1e-5)

    print("KERNEL_OK")
</pallas_src>

<mosaic_0001>
module attributes {stable_mosaic.version = 11 : i64} {
  func.func @_linear_act_kernel(%arg0: i32, %arg1: memref<16x32xf32, #tpu.memory_space<vmem>>, %arg2: memref<128x32xf32, #tpu.memory_space<vmem>>, %arg3: memref<16x128xf32, #tpu.memory_space<vmem>>) attributes {dimension_semantics = [#tpu.dimension_semantics<parallel>], iteration_bounds = array<i64: 1>, scalar_prefetch = 0 : i64, scratch_operands = 0 : i64, tpu.core_type = #tpu.core_type<tc>, window_params = [{transform_indices = @transform_0, window_bounds = array<i64: 16, 32>}, {pipeline_mode = #tpu.pipeline_mode<synchronous>, transform_indices = @transform_1, window_bounds = array<i64: 128, 32>}, {transform_indices = @transform_2, window_bounds = array<i64: 16, 128>}]} {
    %c0 = arith.constant 0 : index
    %c0_0 = arith.constant 0 : index
    %0 = vector.load %arg1[%c0, %c0_0] : memref<16x32xf32, #tpu.memory_space<vmem>>, vector<16x32xf32>
    %c0_1 = arith.constant 0 : index
    %c0_2 = arith.constant 0 : index
    %1 = vector.load %arg2[%c0_1, %c0_2] : memref<128x32xf32, #tpu.memory_space<vmem>>, vector<128x32xf32>
    %cst = arith.constant dense<0.000000e+00> : vector<16x128xf32>
    %2 = tpu.matmul %0, %1, %cst {dimension_numbers = #tpu.dot_dimension_numbers<[1], [1], [0], [0], [0, 0, 1, 0], [], []>} : vector<16x32xf32>, vector<128x32xf32>, vector<16x128xf32> -> vector<16x128xf32>
    %c0_3 = arith.constant 0 : index
    %c0_4 = arith.constant 0 : index
    %3 = vector.load %arg3[%c0_3, %c0_4] : memref<16x128xf32, #tpu.memory_space<vmem>>, vector<16x128xf32>
    tpu.vector_store %arg3[%c0_3, %c0_4], %2 {strides = array<i32>} : memref<16x128xf32, #tpu.memory_space<vmem>>, vector<16x128xf32>,
    return
  }
  func.func @transform_0(%arg0: i32) -> (i32, i32) {
    %c0_i32 = arith.constant 0 : i32
    %c0_i32_0 = arith.constant 0 : i32
    return %arg0, %c0_i32 : i32, i32
  }
  func.func @transform_1(%arg0: i32) -> (i32, i32) {
    %c0_i32 = arith.constant 0 : i32
    %c0_i32_0 = arith.constant 0 : i32
    %c0_i32_1 = arith.constant 0 : i32
    return %c0_i32, %c0_i32_0 : i32, i32
  }
  func.func @transform_2(%arg0: i32) -> (i32, i32) {
    %c0_i32 = arith.constant 0 : i32
    %c0_i32_0 = arith.constant 0 : i32
    return %arg0, %c0_i32 : i32, i32
  }
}

</mosaic_0001>

<bundles_post_ra>
// kernel: tpu_custom_call.1
= control target key start
LH: loop header
LB: loop body
LE: loop exit
PB: predicated region body
PF: predicated region fallthrough
CT: control target
= control target key end

     0   :  { %vm30_vm0 = vcmask 261120   ;;  %s383_s0 = inlined_call_operand.vmem [shape: f32[16,32], index: 0, kind: input, shape index: {}]   ;;  %s384_s1 = inlined_call_operand.vmem [shape: f32[128,32], index: 1, kind: input, shape index: {}]   ;;  %s385_s2 = inlined_call_operand.hbm [shape: f32[16,128], index: 2, kind: output, shape index: {}]  }
   0x1   :  { %v29_v0 = vld [vmem:[%s384_s1 + $0x78] sm:$0xff]  ;;  %v28_v1 = vld [vmem:[%s384_s1 + $0x70] sm:$0xff]  ;;  %v27_v2 = vld [vmem:[%s384_s1 + $0x68] sm:$0xff] }
   0x2   :  { %214 = vmatprep.subr.msk.mxu0 %vm30_vm0, %v29_v0  ;;  %v12_v3 = vld [vmem:[%s383_s0] sm:$0xff] }
   0x3   :  { %215 = vmatpush3.xpose.msk.msra.mxu0 %vm30_vm0, %v29_v0  ;;  %246 = vmatprep.mubr.msk.f32.mxu0 %vm30_vm0, %v12_v3 }
   0x4   :  { %216 = vmatprep.subr.msk.mxu0 %vm30_vm0, %v28_v1 }
   0x7   :  { %217 = vmatpush3.xpose.msk.msra.mxu0 %vm30_vm0, %v28_v1 }
   0x8   :  { %7 = vsyncpa [#allocation3], 0  ;;  %218 = vmatprep.subr.msk.mxu0 %vm30_vm0, %v27_v2  ;;  %v26_v4 = vld [vmem:[%s384_s1 + $0x60] sm:$0xff]  ;;  %v25_v5 = vld [vmem:[%s384_s1 + $0x58] sm:$0xff]  ;;  %s274_s17 = smov [#allocation2]  }
   0x9   :  { %v24_v6 = vld [vmem:[%s384_s1 + $0x50] sm:$0xff]  ;;  %v23_v7 = vld [vmem:[%s384_s1 + $0x48] sm:$0xff]  ;;  %v22_v8 = vld [vmem:[%s384_s1 + $0x40] sm:$0xff]  ;;  %s167_s18 = sshll.u32 %s274_s17, 4  ;;  %s168_s18 = int_to_ptr.vmem [resolvable:$true] %s167_s18 }
   0xa   :  { %v21_v9 = vld [vmem:[%s384_s1 + $0x38] sm:$0xff]  ;;  %v20_v10 = vld [vmem:[%s384_s1 + $0x30] sm:$0xff]  ;;  %v19_v11 = vld [vmem:[%s384_s1 + $0x28] sm:$0xff]  ;;  %p257_p1 = scmp.lt.s32.totalorder %s168_s18, %s168_s18 }
   0xb   :  { %219 = vmatpush3.xpose.msk.msra.mxu0 %vm30_vm0, %v27_v2  ;;  %v18_v12 = vld [vmem:[%s384_s1 + $0x20] sm:$0xff]  ;;  %v17_v13 = vld [vmem:[%s384_s1 + $0x18] sm:$0xff]  ;;  %v16_v14 = vld [vmem:[%s384_s1 + $0x10] sm:$0xff] }
   0xc   :  { %220 = vmatprep.subr.msk.mxu0 %vm30_vm0, %v26_v4  ;;  %v15_v15 = vld [vmem:[%s384_s1 + $0x8] sm:$0xff]  ;;  %v14_v16 = vld [vmem:[%s384_s1] sm:$0xff]  ;;  %s252_s1 = scalar_lea.vmem %s168_s18, 256 }
   0xd   :  { %v13_v17 = vld [vmem:[%s383_s0 + $0x8] sm:$0xff]  ;;  %p253_p0 = scmp.ne.s32.totalorder %s168_s18, %s252_s1  ;;  %p258_p2 = scmp.lt.s32.totalorder %s252_s1, %s252_s1 }
   0xf   :  { %221 = vmatpush3.xpose.msk.msra.mxu0 %vm30_vm0, %v26_v4  ;;  %p259_p3 = por %p258_p2, %p257_p1 }
  0x10   :  { %222 = vmatprep.subr.msk.mxu0 %vm30_vm0, %v25_v5 }
  0x11   :  { %p260_p4 = pnand %p259_p3, %p253_p0 }
  0x13   :  { %223 = vmatpush3.xpose.msk.msra.mxu0 %vm30_vm0, %v25_v5 }
  0x14   :  { %224 = vmatprep.subr.msk.mxu0 %vm30_vm0, %v24_v6 }
  0x17   :  { %225 = vmatpush3.xpose.msk.msra.mxu0 %vm30_vm0, %v24_v6 }
  0x18   :  { %226 = vmatprep.subr.msk.mxu0 %vm30_vm0, %v23_v7 }
  0x1b   :  { %227 = vmatpush3.xpose.msk.msra.mxu0 %vm30_vm0, %v23_v7 }
  0x1c   :  { %228 = vmatprep.subr.msk.mxu0 %vm30_vm0, %v22_v8 }
  0x1f   :  { %229 = vmatpush3.xpose.msk.msra.mxu0 %vm30_vm0, %v22_v8 }
  0x20   :  { %230 = vmatprep.subr.msk.mxu0 %vm30_vm0, %v21_v9 }
  0x23   :  { %231 = vmatpush3.xpose.msk.msra.mxu0 %vm30_vm0, %v21_v9 }
  0x24   :  { %232 = vmatprep.subr.msk.mxu0 %vm30_vm0, %v20_v10 }
  0x27   :  { %233 = vmatpush3.xpose.msk.msra.mxu0 %vm30_vm0, %v20_v10 }
  0x28   :  { %234 = vmatprep.subr.msk.mxu0 %vm30_vm0, %v19_v11 }
  0x2b   :  { %235 = vmatpush3.xpose.msk.msra.mxu0 %vm30_vm0, %v19_v11 }
  0x2c   :  { %236 = vmatprep.subr.msk.mxu0 %vm30_vm0, %v18_v12 }
  0x2f   :  { %237 = vmatpush3.xpose.msk.msra.mxu0 %vm30_vm0, %v18_v12 }
  0x30   :  { %238 = vmatprep.subr.msk.mxu0 %vm30_vm0, %v17_v13 }
  0x33   :  { %239 = vmatpush3.xpose.msk.msra.mxu0 %vm30_vm0, %v17_v13 }
  0x34   :  { %240 = vmatprep.subr.msk.mxu0 %vm30_vm0, %v16_v14 }
  0x37   :  { %241 = vmatpush3.xpose.msk.msra.mxu0 %vm30_vm0, %v16_v14 }
  0x38   :  { %242 = vmatprep.subr.msk.mxu0 %vm30_vm0, %v15_v15 }
  0x3b   :  { %243 = vmatpush3.xpose.msk.msra.mxu0 %vm30_vm0, %v15_v15 }
  0x3c   :  { %244 = vmatprep.subr.msk.mxu0 %vm30_vm0, %v14_v16 }
  0x3f   :  { %245 = vmatpush3.xpose.msk.msra.mxu0 %vm30_vm0, %v14_v16 }
  0x42   :  { %247 = vmatmul.mubr.msk.f32.vlgmr.msra.gmra.mxu0 %vm30_vm0, %v13_v17 }
 0x102   :  { %v248_v18 = vpop.f32.mrf.mxu0 }
 0x103   :  { %161 = vst [vmem:[#allocation2 + $0x8] sm:$0xff] %v248_v18 }
 0x104   :  { %v151_v19 = vpop.f32.mrf.mxu0 }
 0x105   :  { %160 = vst [vmem:[#allocation2] sm:$0xff] %v151_v19 }
 0x106   :  { %263 = shalt.err (!%p260_p4)
}
 0x107   :  { %s275_s19 = smov 128   ;;  %s276_s20 = smov 8  }
 0x108   :  { %173 = dma.vmem_to_hbm [thread:$0]  %s168_s18, 256, %s385_s2, [#allocation3], %s275_s19, %s275_s19, %s276_s20  }
 0x109   :  { %272 = dma.done.wait [#allocation3], 256  }
 0x10a   :  { %273 = vsyncadd [#allocation3], 4294967040 }
 0x10b   :  { %177 = vsyncpa [#allocation3], 1 }

</bundles_post_ra>
